<compile_context>
chip_gen: v6e
topology: v6e:2x2x1
jax: 0.10.0
libtpu: 0.0.40
codegen_flags: <defaults>
</compile_context>

<pallas_src>
import jax
import jax.numpy as jnp
from jax.experimental import pallas as pl
from jax.experimental.pallas import tpu as pltpu

INPUT_SIZE = 64 * 64  # 4096, as in the reference module
H1 = 128
H2 = 64
OUT = 1


def pothole_ann_kernel(x_ref, w1_ref, b1_ref, w2_ref, b2_ref, w3_ref, b3_ref, o_ref):
    # x arrives f32; cast to bf16 on the VPU (hidden under the x DMA) for the MXU.
    x_bf16 = x_ref[...].astype(jnp.bfloat16)

    # fc1 + ReLU (dropout1 == identity in eval mode).  bf16 MXU, f32 accumulation.
    h1 = jnp.dot(x_bf16, w1_ref[...], preferred_element_type=jnp.float32)
    h1 = jnp.maximum(h1 + b1_ref[...], 0.0)

    # fc2 + ReLU (dropout2 == identity in eval mode).
    h2 = jnp.dot(h1.astype(jnp.bfloat16), w2_ref[...],
                 preferred_element_type=jnp.float32)
    h2 = jnp.maximum(h2 + b2_ref[...], 0.0)

    # fc3 (out_features == 1): VPU multiply + cross-lane reduce instead of an N=1
    # MXU matmul; w3 arrives as a (1, H2) f32 row.
    logits = jnp.sum(h2 * w3_ref[...], axis=-1, keepdims=True) + b3_ref[...]

    # sigmoid in f32 (exp(-x) overflow for very negative logits -> 0, the correct limit).
    o_ref[...] = 1.0 / (1.0 + jnp.exp(-logits))


def _round_up(n, m):
    return ((n + m - 1) // m) * m


def _auto_batch_tile(B):
    # Small batch: one block covering the full batch dim (block == full dim is legal).
    if B <= 512:
        return B
    # Mid-size: keep >= 2 grid steps so the "parallel" axis can split across v7x's
    # two TensorCores; round to a VMEM/sublane-friendly multiple.
    if B <= 2048:
        return min(1024, _round_up(pl.cdiv(B, 2), 256))
    # Large batch: 1024-row f32 tile (16 MiB), double-buffered ~= 32 MiB, which fits
    # the explicit 48 MiB vmem limit on all of v5e / v6e / v7x.
    return 1024


def pothole_ann(x, w1, b1, w2, b2, w3, b3, *, batch_tile=None):
    """Forward pass.  x: (B, INPUT_SIZE); weights (in, out); biases (out,)."""
    B, D = x.shape
    assert D == w1.shape[0]

    if batch_tile is None:
        batch_tile = _auto_batch_tile(B)
    n_tiles = pl.cdiv(B, batch_tile)   # ragged tail handled by Pallas (no jnp.pad)

    # x stays f32 (cast happens in-kernel); weights cast once (tiny, one-time ops).
    x_f32 = x.astype(jnp.float32)
    w1_c = w1.astype(jnp.bfloat16)
    w2_c = w2.astype(jnp.bfloat16)
    w3_row = jnp.reshape(w3, (1, H2)).astype(jnp.float32)
    b1_r = jnp.reshape(b1, (1, H1)).astype(jnp.float32)
    b2_r = jnp.reshape(b2, (1, H2)).astype(jnp.float32)
    b3_r = jnp.reshape(b3, (1, OUT)).astype(jnp.float32)

    cost = pl.CostEstimate(
        flops=2 * B * (D * H1 + H1 * H2 + H2 * OUT),
        transcendentals=B,
        bytes_accessed=(B * D * 4                      # x (f32 HBM read)
                        + D * H1 * 2                   # w1 (bf16)
                        + H1 * H2 * 2                  # w2 (bf16)
                        + (H1 + H2 + H2 + OUT) * 4     # biases + w3 row (f32)
                        + B * OUT * 4),                # output (f32)
    )

    return pl.pallas_call(
        pothole_ann_kernel,
        out_shape=jax.ShapeDtypeStruct((B, OUT), jnp.float32),
        grid_spec=pltpu.PrefetchScalarGridSpec(
            num_scalar_prefetch=0,
            grid=(n_tiles,),
            in_specs=[
                pl.BlockSpec((batch_tile, D), lambda i: (i, 0)),  # x tile (f32)
                pl.BlockSpec((D, H1), lambda i: (0, 0)),          # w1 (resident, bf16)
                pl.BlockSpec((1, H1), lambda i: (0, 0)),          # b1
                pl.BlockSpec((H1, H2), lambda i: (0, 0)),         # w2 (bf16)
                pl.BlockSpec((1, H2), lambda i: (0, 0)),          # b2
                pl.BlockSpec((1, H2), lambda i: (0, 0)),          # w3 row (f32)
                pl.BlockSpec((1, OUT), lambda i: (0, 0)),         # b3
            ],
            out_specs=pl.BlockSpec((batch_tile, OUT), lambda i: (i, 0)),
        ),
        compiler_params=pltpu.CompilerParams(
            # Batch axis is independent -> megacore-shardable on v7x when n_tiles >= 2.
            dimension_semantics=("parallel",),
            # Explicit limit: needed on v5e (16 MiB default scoped VMEM) for large
            # f32 x tiles; well under v7x's 64 MiB physical VMEM.
            vmem_limit_bytes=48 * 1024 * 1024,
        ),
        cost_estimate=cost,
    )(x_f32, w1_c, b1_r, w2_c, b2_r, w3_row, b3_r)


def init_params(key):
    """Deterministic synthetic init (PyTorch-style uniform bounds), float32."""
    k1, k2, k3, k4, k5, k6 = jax.random.split(key, 6)

    def linear_init(kw, kb, fan_in, fan_out):
        bound = 1.0 / jnp.sqrt(fan_in)
        w = jax.random.uniform(kw, (fan_in, fan_out), jnp.float32, -bound, bound)
        b = jax.random.uniform(kb, (fan_out,), jnp.float32, -bound, bound)
        return w, b

    w1, b1 = linear_init(k1, k2, INPUT_SIZE, H1)
    w2, b2 = linear_init(k3, k4, H1, H2)
    w3, b3 = linear_init(k5, k6, H2, OUT)
    return w1, b1, w2, b2, w3, b3


def reference_forward_f32(x, w1, b1, w2, b2, w3, b3):
    h1 = jnp.maximum(x @ w1 + b1[None, :], 0.0)
    h2 = jnp.maximum(h1 @ w2 + b2[None, :], 0.0)
    return jax.nn.sigmoid(h2 @ w3 + b3[None, :])


def reference_forward_mixed(x, w1, b1, w2, b2, w3, b3):
    """Same mixed precision as the kernel (bf16 matmul operands, f32 accumulation)."""
    h1 = jnp.dot(x.astype(jnp.bfloat16), w1.astype(jnp.bfloat16),
                 preferred_element_type=jnp.float32) + b1[None, :]
    h1 = jnp.maximum(h1, 0.0)
    h2 = jnp.dot(h1.astype(jnp.bfloat16), w2.astype(jnp.bfloat16),
                 preferred_element_type=jnp.float32) + b2[None, :]
    h2 = jnp.maximum(h2, 0.0)
    return jax.nn.sigmoid(h2 @ w3 + b3[None, :])


# TODO(synk): training-mode dropout (p=0.5) would need pltpu.prng_seed/prng_random_bits
# masks; eval-mode identity is implemented here (matches module.eval() semantics).

if __name__ == "__main__":
    key = jax.random.PRNGKey(0)
    kx, kx2, kp = jax.random.split(key, 3)
    params = init_params(kp)

    # Small correctness check: single block covering the whole (tiny) batch.
    B_small = 4
    x_small = jax.random.normal(kx, (B_small, INPUT_SIZE), dtype=jnp.float32)
    out_small = jax.block_until_ready(pothole_ann(x_small, *params))
    assert out_small.shape == (B_small, OUT)
    assert jnp.allclose(out_small, reference_forward_mixed(x_small, *params),
                        atol=1e-3, rtol=1e-3)
    assert jnp.allclose(out_small, reference_forward_f32(x_small, *params),
                        atol=1.5e-2)

    # Multi-tile + ragged-tail path: B=300 with an explicit 128-row tile -> grid of 3,
    # last block has only 44 valid rows (no jnp.pad; Pallas masks the tail store).
    B_big = 300
    x_big = jax.random.normal(kx2, (B_big, INPUT_SIZE), dtype=jnp.float32)
    out_big = jax.block_until_ready(pothole_ann(x_big, *params, batch_tile=128))
    assert out_big.shape == (B_big, OUT)
    assert jnp.allclose(out_big, reference_forward_mixed(x_big, *params),
                        atol=1e-3, rtol=1e-3)

    # Auto-tile path (single full-batch block at B=300).
    out_auto = jax.block_until_ready(pothole_ann(x_big, *params))
    assert jnp.allclose(out_auto, out_big, atol=1e-5)

    print("KERNEL_OK")
</pallas_src>

<mosaic_0001>
module attributes {stable_mosaic.version = 11 : i64} {
  func.func @pothole_ann_kernel(%arg0: i32, %arg1: memref<4x4096xf32, #tpu.memory_space<vmem>>, %arg2: memref<4096x128xbf16, #tpu.memory_space<vmem>>, %arg3: memref<1x128xf32, #tpu.memory_space<vmem>>, %arg4: memref<128x64xbf16, #tpu.memory_space<vmem>>, %arg5: memref<1x64xf32, #tpu.memory_space<vmem>>, %arg6: memref<1x64xf32, #tpu.memory_space<vmem>>, %arg7: memref<1x1xf32, #tpu.memory_space<vmem>>, %arg8: memref<4x1xf32, #tpu.memory_space<vmem>>) attributes {dimension_semantics = [#tpu.dimension_semantics<parallel>], iteration_bounds = array<i64: 1>, scalar_prefetch = 0 : i64, scratch_operands = 0 : i64, tpu.core_type = #tpu.core_type<tc>, window_params = [{transform_indices = @transform_0, window_bounds = array<i64: 4, 4096>}, {pipeline_mode = #tpu.pipeline_mode<synchronous>, transform_indices = @transform_1, window_bounds = array<i64: 4096, 128>}, {pipeline_mode = #tpu.pipeline_mode<synchronous>, transform_indices = @transform_2, window_bounds = array<i64: 1, 128>}, {pipeline_mode = #tpu.pipeline_mode<synchronous>, transform_indices = @transform_3, window_bounds = array<i64: 128, 64>}, {pipeline_mode = #tpu.pipeline_mode<synchronous>, transform_indices = @transform_4, window_bounds = array<i64: 1, 64>}, {pipeline_mode = #tpu.pipeline_mode<synchronous>, transform_indices = @transform_5, window_bounds = array<i64: 1, 64>}, {pipeline_mode = #tpu.pipeline_mode<synchronous>, transform_indices = @transform_6, window_bounds = array<i64: 1, 1>}, {transform_indices = @transform_7, window_bounds = array<i64: 4, 1>}]} {
    %c0 = arith.constant 0 : index
    %c0_0 = arith.constant 0 : index
    %0 = vector.load %arg1[%c0, %c0_0] : memref<4x4096xf32, #tpu.memory_space<vmem>>, vector<4x4096xf32>
    %1 = arith.truncf %0 : vector<4x4096xf32> to vector<4x4096xbf16>
    %c0_1 = arith.constant 0 : index
    %c0_2 = arith.constant 0 : index
    %2 = vector.load %arg2[%c0_1, %c0_2] : memref<4096x128xbf16, #tpu.memory_space<vmem>>, vector<4096x128xbf16>
    %cst = arith.constant dense<0.000000e+00> : vector<4x128xf32>
    %3 = tpu.matmul %1, %2, %cst {dimension_numbers = #tpu.dot_dimension_numbers<[1], [0], [0], [1], [0, 0, 1, 1], [], []>} : vector<4x4096xbf16>, vector<4096x128xbf16>, vector<4x128xf32> -> vector<4x128xf32>
    %c0_3 = arith.constant 0 : index
    %c0_4 = arith.constant 0 : index
    %4 = vector.load %arg3[%c0_3, %c0_4] : memref<1x128xf32, #tpu.memory_space<vmem>>, vector<1x128xf32>
    %5 = vector.broadcast %4 : vector<1x128xf32> to vector<4x128xf32>
    %6 = arith.addf %3, %5 : vector<4x128xf32>
    %cst_5 = arith.constant 0.000000e+00 : f32
    %7 = vector.broadcast %cst_5 : f32 to vector<4x128xf32>
    %8 = arith.maximumf %6, %7 : vector<4x128xf32>
    %9 = arith.truncf %8 : vector<4x128xf32> to vector<4x128xbf16>
    %c0_6 = arith.constant 0 : index
    %c0_7 = arith.constant 0 : index
    %10 = vector.load %arg4[%c0_6, %c0_7] : memref<128x64xbf16, #tpu.memory_space<vmem>>, vector<128x64xbf16>
    %cst_8 = arith.constant dense<0.000000e+00> : vector<4x64xf32>
    %11 = tpu.matmul %9, %10, %cst_8 {dimension_numbers = #tpu.dot_dimension_numbers<[1], [0], [0], [1], [0, 0, 1, 1], [], []>} : vector<4x128xbf16>, vector<128x64xbf16>, vector<4x64xf32> -> vector<4x64xf32>
    %c0_9 = arith.constant 0 : index
    %c0_10 = arith.constant 0 : index
    %12 = vector.load %arg5[%c0_9, %c0_10] : memref<1x64xf32, #tpu.memory_space<vmem>>, vector<1x64xf32>
    %13 = vector.broadcast %12 : vector<1x64xf32> to vector<4x64xf32>
    %14 = arith.addf %11, %13 : vector<4x64xf32>
    %cst_11 = arith.constant 0.000000e+00 : f32
    %15 = vector.broadcast %cst_11 : f32 to vector<4x64xf32>
    %16 = arith.maximumf %14, %15 : vector<4x64xf32>
    %c0_12 = arith.constant 0 : index
    %c0_13 = arith.constant 0 : index
    %17 = vector.load %arg6[%c0_12, %c0_13] : memref<1x64xf32, #tpu.memory_space<vmem>>, vector<1x64xf32>
    %18 = vector.broadcast %17 : vector<1x64xf32> to vector<4x64xf32>
    %19 = arith.mulf %16, %18 : vector<4x64xf32>
    %cst_14 = arith.constant dense<0.000000e+00> : vector<4xf32>
    %20 = vector.multi_reduction <add>, %19, %cst_14 [1] : vector<4x64xf32> to vector<4xf32>
    %21 = vector.shape_cast %20 : vector<4xf32> to vector<4x1xf32>
    %c0_15 = arith.constant 0 : index
    %c0_16 = arith.constant 0 : index
    %22 = vector.load %arg7[%c0_15, %c0_16] : memref<1x1xf32, #tpu.memory_space<vmem>>, vector<1x1xf32>
    %23 = vector.broadcast %22 : vector<1x1xf32> to vector<4x1xf32>
    %24 = arith.addf %21, %23 : vector<4x1xf32>
    %cst_17 = arith.constant 0.000000e+00 : f32
    %25 = vector.broadcast %cst_17 : f32 to vector<4x1xf32>
    %26 = arith.subf %25, %24 : vector<4x1xf32>
    %27 = math.exp %26 : vector<4x1xf32>
    %cst_18 = arith.constant 1.000000e+00 : f32
    %28 = vector.broadcast %cst_18 : f32 to vector<4x1xf32>
    %29 = arith.addf %28, %27 : vector<4x1xf32>
    %cst_19 = arith.constant 1.000000e+00 : f32
    %30 = vector.broadcast %cst_19 : f32 to vector<4x1xf32>
    %31 = arith.divf %30, %29 : vector<4x1xf32>
    %c0_20 = arith.constant 0 : index
    %c0_21 = arith.constant 0 : index
    %32 = vector.load %arg8[%c0_20, %c0_21] : memref<4x1xf32, #tpu.memory_space<vmem>>, vector<4x1xf32>
    tpu.vector_store %arg8[%c0_20, %c0_21], %31 {strides = array<i32>} : memref<4x1xf32, #tpu.memory_space<vmem>>, vector<4x1xf32>,
    return
  }
  func.func @transform_0(%arg0: i32) -> (i32, i32) {
    %c0_i32 = arith.constant 0 : i32
    %c0_i32_0 = arith.constant 0 : i32
    return %arg0, %c0_i32 : i32, i32
  }
  func.func @transform_1(%arg0: i32) -> (i32, i32) {
    %c0_i32 = arith.constant 0 : i32
    %c0_i32_0 = arith.constant 0 : i32
    %c0_i32_1 = arith.constant 0 : i32
    return %c0_i32, %c0_i32_0 : i32, i32
  }
  func.func @transform_2(%arg0: i32) -> (i32, i32) {
    %c0_i32 = arith.constant 0 : i32
    %c0_i32_0 = arith.constant 0 : i32
    %c0_i32_1 = arith.constant 0 : i32
    return %c0_i32, %c0_i32_0 : i32, i32
  }
  func.func @transform_3(%arg0: i32) -> (i32, i32) {
    %c0_i32 = arith.constant 0 : i32
    %c0_i32_0 = arith.constant 0 : i32
    %c0_i32_1 = arith.constant 0 : i32
    return %c0_i32, %c0_i32_0 : i32, i32
  }
  func.func @transform_4(%arg0: i32) -> (i32, i32) {
    %c0_i32 = arith.constant 0 : i32
    %c0_i32_0 = arith.constant 0 : i32
    %c0_i32_1 = arith.constant 0 : i32
    return %c0_i32, %c0_i32_0 : i32, i32
  }
  func.func @transform_5(%arg0: i32) -> (i32, i32) {
    %c0_i32 = arith.constant 0 : i32
    %c0_i32_0 = arith.constant 0 : i32
    %c0_i32_1 = arith.constant 0 : i32
    return %c0_i32, %c0_i32_0 : i32, i32
  }
  func.func @transform_6(%arg0: i32) -> (i32, i32) {
    %c0_i32 = arith.constant 0 : i32
    %c0_i32_0 = arith.constant 0 : i32
    %c0_i32_1 = arith.constant 0 : i32
    return %c0_i32, %c0_i32_0 : i32, i32
  }
  func.func @transform_7(%arg0: i32) -> (i32, i32) {
    %c0_i32 = arith.constant 0 : i32
    %c0_i32_0 = arith.constant 0 : i32
    return %arg0, %c0_i32 : i32, i32
  }
}

</mosaic_0001>

<bundles_post_ra>
// kernel: tpu_custom_call.1
= control target key start
LH: loop header
LB: loop body
LE: loop exit
PB: predicated region body
PF: predicated region fallthrough
CT: control target
= control target key end

     0   :  { %s4071_s0 = inlined_call_operand.hbm [shape: f32[4,4096], index: 0, kind: input, shape index: {}]   ;;  %s4072_s1 = inlined_call_operand.hbm [shape: bf16[4096,128], index: 1, kind: input, shape index: {}]   ;;  %s4073_s2 = inlined_call_operand.vmem [shape: f32[1,128], index: 2, kind: input, shape index: {}]   ;;  %s4074_s3 = inlined_call_operand.vmem [shape: bf16[128,64], index: 3, kind: input, shape index: {}]   ;;  %s4075_s4 = inlined_call_operand.vmem [shape: f32[1,64], index: 4, kind: input, shape index: {}]   ;;  %s4076_s5 = inlined_call_operand.vmem [shape: f32[1,64], index: 5, kind: input, shape index: {}]   ;;  %s4077_s6 = inlined_call_operand.<no memory space> [shape: f32[1,1], index: 6, kind: input, shape index: {}]   ;;  %s4078_s7 = inlined_call_operand.vmem [shape: f32[4,1], index: 7, kind: output, shape index: {}]  }
   0x1   :  { %v12_v0 = vstv %s4077_s6 }
   0x2   :  { %13 = vst [vmem:[#allocation2] sm:$0x1] %v12_v0 }
   0x3   :  { %14 = vsyncpa [#allocation4], 0 }
   0x4   :  { %15 = vsyncpa [#allocation6], 0  ;;  %s3977_s26 = smov [#allocation3]   ;;  %s3978_s28 = smov [#allocation5]  }
   0x5   :  { %s22_s27 = sshll.u32 %s3977_s26, 4  ;;  %s31_s29 = sshll.u32 %s3978_s28, 4  ;;  %s23_s27 = int_to_ptr.vmem [resolvable:$true] %s22_s27  ;;  %s32_s29 = int_to_ptr.vmem [resolvable:$true] %s31_s29 }
   0x6   :  { %s3941_s30 = scalar_lea.vmem %s23_s27, 2048  ;;  %p3946_p1 = scmp.lt.s32.totalorder %s23_s27, %s23_s27 }
   0x7   :  { %p3942_p0 = scmp.ne.s32.totalorder %s23_s27, %s3941_s30  ;;  %p3947_p2 = scmp.lt.s32.totalorder %s3941_s30, %s3941_s30 }
   0x9   :  { %p3948_p3 = por %p3947_p2, %p3946_p1 }
   0xb   :  { %p3949_p4 = pnand %p3948_p3, %p3942_p0 }
   0xd   :  { %3952 = shalt.err (!%p3949_p4)
}
   0xe   :  { %25 = dma.hbm_to_vmem [thread:$0]  %s4071_s0, 2048, %s23_s27, [#allocation4]  }
   0xf   :  { %s3961_s6 = scalar_lea.vmem %s32_s29, 32768  ;;  %p3966_p6 = scmp.lt.s32.totalorder %s32_s29, %s32_s29 }
  0x10   :  { %p3962_p5 = scmp.ne.s32.totalorder %s32_s29, %s3961_s6  ;;  %p3967_p7 = scmp.lt.s32.totalorder %s3961_s6, %s3961_s6 }
  0x12   :  { %p3968_p8 = por %p3967_p7, %p3966_p6 }
  0x14   :  { %p3969_p9 = pnand %p3968_p8, %p3962_p5 }
  0x16   :  { %3972 = shalt.err (!%p3969_p9)
}
  0x17   :  { %s3979_s10 = smov 64   ;;  %s3980_s11 = smov 4  }
  0x18   :  { %37 = dma.hbm_to_vmem [thread:$0]  %s4072_s1, 32768, %s32_s29, [#allocation6], %s3979_s10, %s3979_s10, %s3980_s11  }
  0x19   :  { %3973 = dma.done.wait [#allocation4], 2048  }
  0x1a   :  { %3974 = vsyncadd [#allocation4], 4294965248 }
  0x1b   :  { %3975 = dma.done.wait [#allocation6], 32768  }
  0x1c   :  { %3976 = vsyncadd [#allocation6], 4294934528  ;;  %v3649_v1 = vld [vmem:[#allocation5 + $0x78] sm:$0xff]   ;;  %v3653_v5 = vld [vmem:[#allocation5 + $0x70] sm:$0xff]   ;;  %vm3982_vm0 = vmmov 0   ;;  %vm2968_vm1 = vcmask 519168  }
  0x1d   :  { %v3650_v2 = vld [vmem:[#allocation5 + $0xf8] sm:$0xff]   ;;  %3262 = vmatprep.subr.bf16.mxu0 %v3649_v1  ;;  %v3654_v6 = vld [vmem:[#allocation5 + $0xf0] sm:$0xff]   ;;  %v3657_v9 = vld [vmem:[#allocation5 + $0x68] sm:$0xff]   ;;  %vm2986_vm2 = vcmask 3072  }
  0x1e   :  { %v3651_v3 = vld [vmem:[#allocation5 + $0x38] sm:$0xff]   ;;  %3284 = vmatprep.subr.bf16.mxu1 %v3650_v2  ;;  %v3655_v7 = vld [vmem:[#allocation5 + $0x30] sm:$0xff]   ;;  %v3658_v10 = vld [vmem:[#allocation5 + $0xe8] sm:$0xff]  }
  0x1f   :  { %v3652_v4 = vld [vmem:[#allocation5 + $0xb8] sm:$0xff]   ;;  %3263 = vmatpush3.bf16.msra.mxu0 %v3651_v3  ;;  %v3656_v8 = vld [vmem:[#allocation5 + $0xb0] sm:$0xff]   ;;  %v3659_v11 = vld [vmem:[#allocation5 + $0x28] sm:$0xff]  }
  0x20   :  { %3285 = vmatpush3.bf16.msra.mxu1 %v3652_v4  ;;  %3264 = vmatprep.subr.bf16.mxu0 %v3653_v5  ;;  %v3660_v12 = vld [vmem:[#allocation5 + $0xa8] sm:$0xff]   ;;  %v3661_v13 = vld [vmem:[#allocation5 + $0x60] sm:$0xff]   ;;  %v3665_v17 = vld [vmem:[#allocation5 + $0x58] sm:$0xff]  }
  0x21   :  { %3286 = vmatprep.subr.bf16.mxu1 %v3654_v6  ;;  %v3662_v14 = vld [vmem:[#allocation5 + $0xe0] sm:$0xff]   ;;  %v3666_v18 = vld [vmem:[#allocation5 + $0xd8] sm:$0xff]   ;;  %v3669_v21 = vld [vmem:[#allocation5 + $0x50] sm:$0xff]  }
  0x22   :  { %v3663_v15 = vld [vmem:[#allocation5 + $0x20] sm:$0xff]   ;;  %v3667_v19 = vld [vmem:[#allocation5 + $0x18] sm:$0xff]   ;;  %v3670_v22 = vld [vmem:[#allocation5 + $0xd0] sm:$0xff]  }
  0x23   :  { %3265 = vmatpush3.bf16.msra.mxu0 %v3655_v7  ;;  %v3664_v16 = vld [vmem:[#allocation5 + $0xa0] sm:$0xff]   ;;  %v3668_v20 = vld [vmem:[#allocation5 + $0x98] sm:$0xff]   ;;  %v3671_v23 = vld [vmem:[#allocation5 + $0x10] sm:$0xff]  }
  0x24   :  { %3287 = vmatpush3.bf16.msra.mxu1 %v3656_v8  ;;  %3266 = vmatprep.subr.bf16.mxu0 %v3657_v9  ;;  %v3672_v24 = vld [vmem:[#allocation5 + $0x90] sm:$0xff]   ;;  %v3673_v25 = vld [vmem:[#allocation5 + $0x48] sm:$0xff]   ;;  %v3677_v29 = vld [vmem:[#allocation5 + $0x40] sm:$0xff]  }
  0x25   :  { %3288 = vmatprep.subr.bf16.mxu1 %v3658_v10  ;;  %v3674_v26 = vld [vmem:[#allocation5 + $0xc8] sm:$0xff]   ;;  %v3678_v30 = vld [vmem:[#allocation5 + $0xc0] sm:$0xff]   ;;  %v3683_v37 = vld [vmem:[#allocation5 + $0x178] sm:$0xff]  }
  0x26   :  { %v3675_v27 = vld [vmem:[#allocation5 + $0x8] sm:$0xff]   ;;  %v3679_v31 = vld [vmem:[#allocation5] sm:$0xff]   ;;  %v3684_v40 = vld [vmem:[#allocation5 + $0x1f8] sm:$0xff]  }
  0x27   :  { %3267 = vmatpush3.bf16.msra.mxu0 %v3659_v11  ;;  %v3676_v28 = vld [vmem:[#allocation5 + $0x88] sm:$0xff]   ;;  %v3680_v32 = vld [vmem:[#allocation5 + $0x80] sm:$0xff]   ;;  %v3685_v43 = vld [vmem:[#allocation5 + $0x138] sm:$0xff]  }
  0x28   :  { %3289 = vmatpush3.bf16.msra.mxu1 %v3660_v12  ;;  %3268 = vmatprep.subr.bf16.mxu0 %v3661_v13  ;;  %v55_v33 = vld [vmem:[#allocation3] sm:$0xff]  ;;  %v56_v34 = vld [vmem:[#allocation3 + $0x8] sm:$0xff]  ;;  %v3686_v44 = vld [vmem:[#allocation5 + $0x1b8] sm:$0xff]  }
  0x29   :  { %3290 = vmatprep.subr.bf16.mxu1 %v3662_v14  ;;  %v87_v35 = vcombine.high %v55_v33, %v55_v33  ;;  %v88_v36 = vcombine.high %v56_v34, %v56_v34  ;;  %v119_v38 = vpack.c.bf16 %v55_v33, %v55_v33  ;;  %v121_v39 = vpack.c.bf16 %v56_v34, %v56_v34  ;;  %v3687_v45 = vld [vmem:[#allocation5 + $0x170] sm:$0xff]   ;;  %v3691_v49 = vld [vmem:[#allocation5 + $0x168] sm:$0xff]   ;;  %v3695_v53 = vld [vmem:[#allocation5 + $0x160] sm:$0xff]  }
  0x2a   :  { %v3688_v46 = vld [vmem:[#allocation5 + $0x1f0] sm:$0xff]   ;;  %v3692_v50 = vld [vmem:[#allocation5 + $0x1e8] sm:$0xff]   ;;  %v3696_v54 = vld [vmem:[#allocation5 + $0x1e0] sm:$0xff]  }
  0x2b   :  { %3269 = vmatpush3.bf16.msra.mxu0 %v3663_v15  ;;  %v120_v41 = vpack.c.bf16 %v87_v35, %v87_v35  ;;  %v122_v42 = vpack.c.bf16 %v88_v36, %v88_v36  ;;  %v3689_v47 = vld [vmem:[#allocation5 + $0x130] sm:$0xff]   ;;  %v3693_v51 = vld [vmem:[#allocation5 + $0x128] sm:$0xff]   ;;  %v3697_v55 = vld [vmem:[#allocation5 + $0x120] sm:$0xff]  }
  0x2c   :  { %3291 = vmatpush3.bf16.msra.mxu1 %v3664_v16  ;;  %3270 = vmatprep.subr.bf16.mxu0 %v3665_v17  ;;  %v3690_v48 = vld [vmem:[#allocation5 + $0x1b0] sm:$0xff]   ;;  %v3694_v52 = vld [vmem:[#allocation5 + $0x1a8] sm:$0xff]   ;;  %v3698_v56 = vld [vmem:[#allocation5 + $0x1a0] sm:$0xff]  }
  0x2d   :  { %3292 = vmatprep.subr.bf16.mxu1 %v3666_v18  ;;  %2238 = vmatprep.mubr.bf16.mxu0 %v120_v41  ;;  %v3699_v57 = vld [vmem:[#allocation5 + $0x158] sm:$0xff]   ;;  %v3703_v61 = vld [vmem:[#allocation5 + $0x150] sm:$0xff]   ;;  %v3707_v1 = vld [vmem:[#allocation5 + $0x148] sm:$0xff]  }
  0x2e   :  { %2278 = vmatprep.mubr.bf16.mxu1 %v122_v42  ;;  %v3700_v58 = vld [vmem:[#allocation5 + $0x1d8] sm:$0xff]   ;;  %v3704_v62 = vld [vmem:[#allocation5 + $0x1d0] sm:$0xff]   ;;  %v3708_v2 = vld [vmem:[#allocation5 + $0x1c8] sm:$0xff]  }
  0x2f   :  { %3271 = vmatpush3.bf16.msra.mxu0 %v3667_v19  ;;  %v3701_v59 = vld [vmem:[#allocation5 + $0x118] sm:$0xff]   ;;  %v3705_v63 = vld [vmem:[#allocation5 + $0x110] sm:$0xff]   ;;  %v3709_v3 = vld [vmem:[#allocation5 + $0x108] sm:$0xff]  }
  0x30   :  { %3293 = vmatpush3.bf16.msra.mxu1 %v3668_v20  ;;  %3272 = vmatprep.subr.bf16.mxu0 %v3669_v21  ;;  %v3702_v60 = vld [vmem:[#allocation5 + $0x198] sm:$0xff]   ;;  %v3706_v0 = vld [vmem:[#allocation5 + $0x190] sm:$0xff]   ;;  %v3710_v4 = vld [vmem:[#allocation5 + $0x188] sm:$0xff]  }
  0x31   :  { %3294 = vmatprep.subr.bf16.mxu1 %v3670_v22  ;;  %v3711_v5 = vld [vmem:[#allocation5 + $0x140] sm:$0xff]   ;;  %v57_v9 = vld [vmem:[#allocation3 + $0x10] sm:$0xff]  ;;  %v58_v11 = vld [vmem:[#allocation3 + $0x18] sm:$0xff] }
  0x32   :  { %v3712_v6 = vld [vmem:[#allocation5 + $0x1c0] sm:$0xff]   ;;  %v89_v10 = vcombine.high %v57_v9, %v57_v9  ;;  %v123_v12 = vpack.c.bf16 %v57_v9, %v57_v9  ;;  %v90_v13 = vcombine.high %v58_v11, %v58_v11  ;;  %v3717_v14 = vld [vmem:[#allocation5 + $0x278] sm:$0xff]   ;;  %v125_v16 = vpack.c.bf16 %v58_v11, %v58_v11  ;;  %v3721_v21 = vld [vmem:[#allocation5 + $0x270] sm:$0xff]  }
  0x33   :  { %3273 = vmatpush3.bf16.msra.mxu0 %v3671_v23  ;;  %v3713_v7 = vld [vmem:[#allocation5 + $0x100] sm:$0xff]   ;;  %v3718_v17 = vld [vmem:[#allocation5 + $0x2f8] sm:$0xff]   ;;  %v3722_v22 = vld [vmem:[#allocation5 + $0x2f0] sm:$0xff]  }
  0x34   :  { %3295 = vmatpush3.bf16.msra.mxu1 %v3672_v24  ;;  %3274 = vmatprep.subr.bf16.mxu0 %v3673_v25  ;;  %v3714_v8 = vld [vmem:[#allocation5 + $0x180] sm:$0xff]   ;;  %v124_v15 = vpack.c.bf16 %v89_v10, %v89_v10  ;;  %v126_v18 = vpack.c.bf16 %v90_v13, %v90_v13  ;;  %v3719_v19 = vld [vmem:[#allocation5 + $0x238] sm:$0xff]   ;;  %v3723_v23 = vld [vmem:[#allocation5 + $0x230] sm:$0xff]  }
  0x35   :  { %3296 = vmatprep.subr.bf16.mxu1 %v3674_v26  ;;  %v3720_v20 = vld [vmem:[#allocation5 + $0x2b8] sm:$0xff]   ;;  %v3724_v24 = vld [vmem:[#allocation5 + $0x2b0] sm:$0xff]   ;;  %v3725_v25 = vld [vmem:[#allocation5 + $0x268] sm:$0xff]  }
  0x36   :  { %v3726_v26 = vld [vmem:[#allocation5 + $0x2e8] sm:$0xff]   ;;  %v3733_v33 = vld [vmem:[#allocation5 + $0x258] sm:$0xff]   ;;  %v3771_v13 = vld [vmem:[#allocation5 + $0x350] sm:$0xff]  }
  0x37   :  { %3275 = vmatpush3.bf16.msra.mxu0 %v3675_v27  ;;  %v3727_v27 = vld [vmem:[#allocation5 + $0x228] sm:$0xff]   ;;  %v3734_v34 = vld [vmem:[#allocation5 + $0x2d8] sm:$0xff]  }
  0x38   :  { %3297 = vmatpush3.bf16.msra.mxu1 %v3676_v28  ;;  %3276 = vmatprep.subr.bf16.mxu0 %v3677_v29  ;;  %v3728_v28 = vld [vmem:[#allocation5 + $0x2a8] sm:$0xff]   ;;  %v3729_v29 = vld [vmem:[#allocation5 + $0x260] sm:$0xff]   ;;  %v3735_v35 = vld [vmem:[#allocation5 + $0x218] sm:$0xff]  }
  0x39   :  { %3298 = vmatprep.subr.bf16.mxu1 %v3678_v30  ;;  %v3730_v30 = vld [vmem:[#allocation5 + $0x2e0] sm:$0xff]   ;;  %v3736_v36 = vld [vmem:[#allocation5 + $0x298] sm:$0xff]   ;;  %v3741_v41 = vld [vmem:[#allocation5 + $0x248] sm:$0xff]  }
  0x3a   :  { %v3742_v42 = vld [vmem:[#allocation5 + $0x2c8] sm:$0xff]   ;;  %v3767_v9 = vld [vmem:[#allocation5 + $0x358] sm:$0xff]  }
  0x3b   :  { %3277 = vmatpush3.bf16.msra.mxu0 %v3679_v31  ;;  %v3731_v31 = vld [vmem:[#allocation5 + $0x220] sm:$0xff]   ;;  %v3768_v10 = vld [vmem:[#allocation5 + $0x3d8] sm:$0xff]  }
  0x3c   :  { %3299 = vmatpush3.bf16.msra.mxu1 %v3680_v32  ;;  %3306 = vmatprep.subr.bf16.mxu0 %v3683_v37  ;;  %v3732_v32 = vld [vmem:[#allocation5 + $0x2a0] sm:$0xff]   ;;  %v3737_v37 = vld [vmem:[#allocation5 + $0x250] sm:$0xff]   ;;  %v3769_v11 = vld [vmem:[#allocation5 + $0x318] sm:$0xff]  }
  0x3d   :  { %3328 = vmatprep.subr.bf16.mxu1 %v3684_v40  ;;  %v3740_v40 = vld [vmem:[#allocation5 + $0x290] sm:$0xff]  }
  0x3e   :  { %2239 = vmatmul.mubr.bf16.vlgmr.msra.gmra.mxu0 %v119_v38  ;;  %v3738_v38 = vld [vmem:[#allocation5 + $0x2d0] sm:$0xff]  }
  0x3f   :  { %2279 = vmatmul.mubr.bf16.vlgmr.msra.gmra.mxu1 %v121_v39  ;;  %3307 = vmatpush3.bf16.msra.mxu0 %v3685_v43  ;;  %v3739_v39 = vld [vmem:[#allocation5 + $0x210] sm:$0xff]   ;;  %v3743_v43 = vld [vmem:[#allocation5 + $0x208] sm:$0xff]  }
  0x40   :  { %3329 = vmatpush3.bf16.msra.mxu1 %v3686_v44  ;;  %3308 = vmatprep.subr.bf16.mxu0 %v3687_v45  ;;  %v3744_v44 = vld [vmem:[#allocation5 + $0x288] sm:$0xff]   ;;  %v3745_v45 = vld [vmem:[#allocation5 + $0x240] sm:$0xff]  }
  0x41   :  { %3330 = vmatprep.subr.bf16.mxu1 %v3688_v46  ;;  %2318 = vmatprep.mubr.bf16.mxu0 %v124_v15  ;;  %v3746_v46 = vld [vmem:[#allocation5 + $0x2c0] sm:$0xff]   ;;  %v3773_v15 = vld [vmem:[#allocation5 + $0x310] sm:$0xff]  }
  0x42   :  { %2358 = vmatprep.mubr.bf16.mxu1 %v126_v18  ;;  %v3776_v18 = vld [vmem:[#allocation5 + $0x3c8] sm:$0xff]  }
  0x43   :  { %3309 = vmatpush3.bf16.msra.mxu0 %v3689_v47  ;;  %v3747_v47 = vld [vmem:[#allocation5 + $0x200] sm:$0xff]  }
  0x44   :  { %3331 = vmatpush3.bf16.msra.mxu1 %v3690_v48  ;;  %3310 = vmatprep.subr.bf16.mxu0 %v3691_v49  ;;  %v3748_v48 = vld [vmem:[#allocation5 + $0x280] sm:$0xff]  }
  0x45   :  { %3332 = vmatprep.subr.bf16.mxu1 %v3692_v50  ;;  %v59_v49 = vld [vmem:[#allocation3 + $0x20] sm:$0xff]  ;;  %v60_v50 = vld [vmem:[#allocation3 + $0x28] sm:$0xff] }
  0x47   :  { %3311 = vmatpush3.bf16.msra.mxu0 %v3693_v51  ;;  %v91_v51 = vcombine.high %v59_v49, %v59_v49 }
  0x48   :  { %3333 = vmatpush3.bf16.msra.mxu1 %v3694_v52  ;;  %3312 = vmatprep.subr.bf16.mxu0 %v3695_v53  ;;  %v92_v52 = vcombine.high %v60_v50, %v60_v50  ;;  %v3751_v53 = vld [vmem:[#allocation5 + $0x378] sm:$0xff]  }
  0x49   :  { %3334 = vmatprep.subr.bf16.mxu1 %v3696_v54  ;;  %v127_v54 = vpack.c.bf16 %v59_v49, %v59_v49  ;;  %v3801_v49 = vld [vmem:[#allocation5 + $0x458] sm:$0xff]  }
  0x4b   :  { %3313 = vmatpush3.bf16.msra.mxu0 %v3697_v55  ;;  %v129_v55 = vpack.c.bf16 %v60_v50, %v60_v50  ;;  %v3802_v50 = vld [vmem:[#allocation5 + $0x4d8] sm:$0xff]  }
  0x4c   :  { %3335 = vmatpush3.bf16.msra.mxu1 %v3698_v56  ;;  %3314 = vmatprep.subr.bf16.mxu0 %v3699_v57  ;;  %v3752_v56 = vld [vmem:[#allocation5 + $0x3f8] sm:$0xff]   ;;  %v128_v57 = vpack.c.bf16 %v91_v51, %v91_v51 }
  0x4d   :  { %3336 = vmatprep.subr.bf16.mxu1 %v3700_v58  ;;  %v130_v58 = vpack.c.bf16 %v92_v52, %v92_v52  ;;  %v3803_v51 = vld [vmem:[#allocation5 + $0x418] sm:$0xff]  }
  0x4e   :  { %v3804_v52 = vld [vmem:[#allocation5 + $0x498] sm:$0xff]  }
  0x4f   :  { %3315 = vmatpush3.bf16.msra.mxu0 %v3701_v59  ;;  %v3753_v59 = vld [vmem:[#allocation5 + $0x338] sm:$0xff]  }
  0x50   :  { %3337 = vmatpush3.bf16.msra.mxu1 %v3702_v60  ;;  %3316 = vmatprep.subr.bf16.mxu0 %v3703_v61  ;;  %v3754_v60 = vld [vmem:[#allocation5 + $0x3b8] sm:$0xff]   ;;  %v3755_v61 = vld [vmem:[#allocation5 + $0x370] sm:$0xff]  }
  0x51   :  { %3338 = vmatprep.subr.bf16.mxu1 %v3704_v62  ;;  %v3756_v62 = vld [vmem:[#allocation5 + $0x3f0] sm:$0xff]  }
  0x53   :  { %3317 = vmatpush3.bf16.msra.mxu0 %v3705_v63  ;;  %v3757_v63 = vld [vmem:[#allocation5 + $0x330] sm:$0xff]  }
  0x54   :  { %3339 = vmatpush3.bf16.msra.mxu1 %v3706_v0  ;;  %3318 = vmatprep.subr.bf16.mxu0 %v3707_v1  ;;  %v3758_v0 = vld [vmem:[#allocation5 + $0x3b0] sm:$0xff]   ;;  %v3759_v1 = vld [vmem:[#allocation5 + $0x368] sm:$0xff]  }
  0x55   :  { %3340 = vmatprep.subr.bf16.mxu1 %v3708_v2  ;;  %v3760_v2 = vld [vmem:[#allocation5 + $0x3e8] sm:$0xff]  }
  0x57   :  { %3319 = vmatpush3.bf16.msra.mxu0 %v3709_v3  ;;  %v3761_v3 = vld [vmem:[#allocation5 + $0x328] sm:$0xff]  }
  0x58   :  { %3341 = vmatpush3.bf16.msra.mxu1 %v3710_v4  ;;  %3320 = vmatprep.subr.bf16.mxu0 %v3711_v5  ;;  %v3762_v4 = vld [vmem:[#allocation5 + $0x3a8] sm:$0xff]   ;;  %v3763_v5 = vld [vmem:[#allocation5 + $0x360] sm:$0xff]  }
  0x59   :  { %3342 = vmatprep.subr.bf16.mxu1 %v3712_v6  ;;  %v3764_v6 = vld [vmem:[#allocation5 + $0x3e0] sm:$0xff]  }
  0x5b   :  { %3321 = vmatpush3.bf16.msra.mxu0 %v3713_v7  ;;  %v3765_v7 = vld [vmem:[#allocation5 + $0x320] sm:$0xff]  }
  0x5c   :  { %3343 = vmatpush3.bf16.msra.mxu1 %v3714_v8  ;;  %3350 = vmatprep.subr.bf16.mxu0 %v3717_v14  ;;  %v3766_v8 = vld [vmem:[#allocation5 + $0x3a0] sm:$0xff]   ;;  %v3772_v14 = vld [vmem:[#allocation5 + $0x3d0] sm:$0xff]  }
  0x5d   :  { %3372 = vmatprep.subr.bf16.mxu1 %v3718_v17  ;;  %v3775_v17 = vld [vmem:[#allocation5 + $0x348] sm:$0xff]  }
  0x5e   :  { %2319 = vmatmul.mubr.bf16.vlgmr.msra.gmra.mxu0 %v123_v12  ;;  %v3770_v12 = vld [vmem:[#allocation5 + $0x398] sm:$0xff]  }
  0x5f   :  { %2359 = vmatmul.mubr.bf16.vlgmr.msra.gmra.mxu1 %v125_v16  ;;  %3351 = vmatpush3.bf16.msra.mxu0 %v3719_v19  ;;  %v3774_v16 = vld [vmem:[#allocation5 + $0x390] sm:$0xff]   ;;  %v3777_v19 = vld [vmem:[#allocation5 + $0x308] sm:$0xff]  }
  0x60   :  { %3373 = vmatpush3.bf16.msra.mxu1 %v3720_v20  ;;  %3352 = vmatprep.subr.bf16.mxu0 %v3721_v21  ;;  %v3778_v20 = vld [vmem:[#allocation5 + $0x388] sm:$0xff]   ;;  %v3779_v21 = vld [vmem:[#allocation5 + $0x340] sm:$0xff]  }
  0x61   :  { %3374 = vmatprep.subr.bf16.mxu1 %v3722_v22  ;;  %2398 = vmatprep.mubr.bf16.mxu0 %v128_v57  ;;  %v3780_v22 = vld [vmem:[#allocation5 + $0x3c0] sm:$0xff]   ;;  %v3809_v57 = vld [vmem:[#allocation5 + $0x448] sm:$0xff]  }
  0x62   :  { %2438 = vmatprep.mubr.bf16.mxu1 %v130_v58  ;;  %v3810_v58 = vld [vmem:[#allocation5 + $0x4c8] sm:$0xff]  }
  0x63   :  { %3353 = vmatpush3.bf16.msra.mxu0 %v3723_v23  ;;  %v3781_v23 = vld [vmem:[#allocation5 + $0x300] sm:$0xff]  }
  0x64   :  { %3375 = vmatpush3.bf16.msra.mxu1 %v3724_v24  ;;  %3354 = vmatprep.subr.bf16.mxu0 %v3725_v25  ;;  %v3782_v24 = vld [vmem:[#allocation5 + $0x380] sm:$0xff]   ;;  %v61_v25 = vld [vmem:[#allocation3 + $0x30] sm:$0xff] }
  0x65   :  { %3376 = vmatprep.subr.bf16.mxu1 %v3726_v26  ;;  %v62_v26 = vld [vmem:[#allocation3 + $0x38] sm:$0xff] }
  0x67   :  { %3355 = vmatpush3.bf16.msra.mxu0 %v3727_v27  ;;  %v93_v27 = vcombine.high %v61_v25, %v61_v25 }
  0x68   :  { %3377 = vmatpush3.bf16.msra.mxu1 %v3728_v28  ;;  %3356 = vmatprep.subr.bf16.mxu0 %v3729_v29  ;;  %v94_v28 = vcombine.high %v62_v26, %v62_v26  ;;  %v3785_v29 = vld [vmem:[#allocation5 + $0x478] sm:$0xff]  }
  0x69   :  { %3378 = vmatprep.subr.bf16.mxu1 %v3730_v30  ;;  %v131_v30 = vpack.c.bf16 %v61_v25, %v61_v25  ;;  %v3835_v25 = vld [vmem:[#allocation5 + $0x558] sm:$0xff]  }
  0x6b   :  { %3357 = vmatpush3.bf16.msra.mxu0 %v3731_v31  ;;  %v133_v31 = vpack.c.bf16 %v62_v26, %v62_v26  ;;  %v3836_v26 = vld [vmem:[#allocation5 + $0x5d8] sm:$0xff]  }
  0x6c   :  { %3379 = vmatpush3.bf16.msra.mxu1 %v3732_v32  ;;  %3358 = vmatprep.subr.bf16.mxu0 %v3733_v33  ;;  %v3786_v32 = vld [vmem:[#allocation5 + $0x4f8] sm:$0xff]   ;;  %v132_v33 = vpack.c.bf16 %v93_v27, %v93_v27 }
  0x6d   :  { %3380 = vmatprep.subr.bf16.mxu1 %v3734_v34  ;;  %v134_v34 = vpack.c.bf16 %v94_v28, %v94_v28  ;;  %v3837_v27 = vld [vmem:[#allocation5 + $0x518] sm:$0xff]  }
  0x6e   :  { %v3838_v28 = vld [vmem:[#allocation5 + $0x598] sm:$0xff]  }
  0x6f   :  { %3359 = vmatpush3.bf16.msra.mxu0 %v3735_v35  ;;  %v3787_v35 = vld [vmem:[#allocation5 + $0x438] sm:$0xff]  }
  0x70   :  { %3381 = vmatpush3.bf16.msra.mxu1 %v3736_v36  ;;  %3360 = vmatprep.subr.bf16.mxu0 %v3737_v37  ;;  %v3788_v36 = vld [vmem:[#allocation5 + $0x4b8] sm:$0xff]   ;;  %v3789_v37 = vld [vmem:[#allocation5 + $0x470] sm:$0xff]  }
  0x71   :  { %3382 = vmatprep.subr.bf16.mxu1 %v3738_v38  ;;  %v3790_v38 = vld [vmem:[#allocation5 + $0x4f0] sm:$0xff]  }
  0x73   :  { %3361 = vmatpush3.bf16.msra.mxu0 %v3739_v39  ;;  %v3791_v39 = vld [vmem:[#allocation5 + $0x430] sm:$0xff]  }
  0x74   :  { %3383 = vmatpush3.bf16.msra.mxu1 %v3740_v40  ;;  %3362 = vmatprep.subr.bf16.mxu0 %v3741_v41  ;;  %v3792_v40 = vld [vmem:[#allocation5 + $0x4b0] sm:$0xff]   ;;  %v3793_v41 = vld [vmem:[#allocation5 + $0x468] sm:$0xff]  }
  0x75   :  { %3384 = vmatprep.subr.bf16.mxu1 %v3742_v42  ;;  %v3794_v42 = vld [vmem:[#allocation5 + $0x4e8] sm:$0xff]  }
  0x77   :  { %3363 = vmatpush3.bf16.msra.mxu0 %v3743_v43  ;;  %v3795_v43 = vld [vmem:[#allocation5 + $0x428] sm:$0xff]  }
  0x78   :  { %3385 = vmatpush3.bf16.msra.mxu1 %v3744_v44  ;;  %3364 = vmatprep.subr.bf16.mxu0 %v3745_v45  ;;  %v3796_v44 = vld [vmem:[#allocation5 + $0x4a8] sm:$0xff]   ;;  %v3797_v45 = vld [vmem:[#allocation5 + $0x460] sm:$0xff]  }
  0x79   :  { %3386 = vmatprep.subr.bf16.mxu1 %v3746_v46  ;;  %v3798_v46 = vld [vmem:[#allocation5 + $0x4e0] sm:$0xff]  }
  0x7b   :  { %3365 = vmatpush3.bf16.msra.mxu0 %v3747_v47  ;;  %v3799_v47 = vld [vmem:[#allocation5 + $0x420] sm:$0xff]  }
  0x7c   :  { %3387 = vmatpush3.bf16.msra.mxu1 %v3748_v48  ;;  %3394 = vmatprep.subr.bf16.mxu0 %v3751_v53  ;;  %v3800_v48 = vld [vmem:[#allocation5 + $0x4a0] sm:$0xff]   ;;  %v3805_v53 = vld [vmem:[#allocation5 + $0x450] sm:$0xff]  }
  0x7d   :  { %3416 = vmatprep.subr.bf16.mxu1 %v3752_v56  ;;  %v3808_v56 = vld [vmem:[#allocation5 + $0x490] sm:$0xff]  }
  0x7e   :  { %2399 = vmatmul.mubr.bf16.vlgmr.msra.gmra.mxu0 %v127_v54  ;;  %v3806_v54 = vld [vmem:[#allocation5 + $0x4d0] sm:$0xff]  }
  0x7f   :  { %2439 = vmatmul.mubr.bf16.vlgmr.msra.gmra.mxu1 %v129_v55  ;;  %3395 = vmatpush3.bf16.msra.mxu0 %v3753_v59  ;;  %v3807_v55 = vld [vmem:[#allocation5 + $0x410] sm:$0xff]   ;;  %v3811_v59 = vld [vmem:[#allocation5 + $0x408] sm:$0xff]  }
  0x80   :  { %3417 = vmatpush3.bf16.msra.mxu1 %v3754_v60  ;;  %3396 = vmatprep.subr.bf16.mxu0 %v3755_v61  ;;  %v3812_v60 = vld [vmem:[#allocation5 + $0x488] sm:$0xff]   ;;  %v3813_v61 = vld [vmem:[#allocation5 + $0x440] sm:$0xff]  }
  0x81   :  { %3418 = vmatprep.subr.bf16.mxu1 %v3756_v62  ;;  %2478 = vmatprep.mubr.bf16.mxu0 %v132_v33  ;;  %v3814_v62 = vld [vmem:[#allocation5 + $0x4c0] sm:$0xff]   ;;  %v3843_v33 = vld [vmem:[#allocation5 + $0x548] sm:$0xff]  }
  0x82   :  { %2518 = vmatprep.mubr.bf16.mxu1 %v134_v34  ;;  %v3844_v34 = vld [vmem:[#allocation5 + $0x5c8] sm:$0xff]  }
  0x83   :  { %3397 = vmatpush3.bf16.msra.mxu0 %v3757_v63  ;;  %v3815_v63 = vld [vmem:[#allocation5 + $0x400] sm:$0xff]  }
  0x84   :  { %3419 = vmatpush3.bf16.msra.mxu1 %v3758_v0  ;;  %3398 = vmatprep.subr.bf16.mxu0 %v3759_v1  ;;  %v3816_v0 = vld [vmem:[#allocation5 + $0x480] sm:$0xff]  }
  0x85   :  { %3420 = vmatprep.subr.bf16.mxu1 %v3760_v2  ;;  %v63_v1 = vld [vmem:[#allocation3 + $0x40] sm:$0xff] }
  0x86   :  { %v95_v2 = vcombine.high %v63_v1, %v63_v1 }
  0x87   :  { %3399 = vmatpush3.bf16.msra.mxu0 %v3761_v3  ;;  %v64_v3 = vld [vmem:[#allocation3 + $0x48] sm:$0xff] }
  0x88   :  { %3421 = vmatpush3.bf16.msra.mxu1 %v3762_v4  ;;  %3400 = vmatprep.subr.bf16.mxu0 %v3763_v5  ;;  %v135_v4 = vpack.c.bf16 %v63_v1, %v63_v1  ;;  %v96_v5 = vcombine.high %v64_v3, %v64_v3  ;;  %v3869_v1 = vld [vmem:[#allocation5 + $0x658] sm:$0xff]  }
  0x89   :  { %3422 = vmatprep.subr.bf16.mxu1 %v3764_v6  ;;  %v3819_v6 = vld [vmem:[#allocation5 + $0x578] sm:$0xff]  }
  0x8b   :  { %3401 = vmatpush3.bf16.msra.mxu0 %v3765_v7  ;;  %v136_v7 = vpack.c.bf16 %v95_v2, %v95_v2  ;;  %v3870_v2 = vld [vmem:[#allocation5 + $0x6d8] sm:$0xff]  }
  0x8c   :  { %3423 = vmatpush3.bf16.msra.mxu1 %v3766_v8  ;;  %3402 = vmatprep.subr.bf16.mxu0 %v3767_v9  ;;  %v137_v8 = vpack.c.bf16 %v64_v3, %v64_v3  ;;  %v3820_v9 = vld [vmem:[#allocation5 + $0x5f8] sm:$0xff]  }
  0x8d   :  { %3424 = vmatprep.subr.bf16.mxu1 %v3768_v10  ;;  %v138_v10 = vpack.c.bf16 %v96_v5, %v96_v5  ;;  %v3871_v3 = vld [vmem:[#allocation5 + $0x618] sm:$0xff]   ;;  %v3873_v5 = vld [vmem:[#allocation5 + $0x650] sm:$0xff]  }
  0x8f   :  { %3403 = vmatpush3.bf16.msra.mxu0 %v3769_v11  ;;  %v3821_v11 = vld [vmem:[#allocation5 + $0x538] sm:$0xff]  }
  0x90   :  { %3425 = vmatpush3.bf16.msra.mxu1 %v3770_v12  ;;  %3404 = vmatprep.subr.bf16.mxu0 %v3771_v13  ;;  %v3822_v12 = vld [vmem:[#allocation5 + $0x5b8] sm:$0xff]   ;;  %v3823_v13 = vld [vmem:[#allocation5 + $0x570] sm:$0xff]  }
  0x91   :  { %3426 = vmatprep.subr.bf16.mxu1 %v3772_v14  ;;  %v3824_v14 = vld [vmem:[#allocation5 + $0x5f0] sm:$0xff]  }
  0x93   :  { %3405 = vmatpush3.bf16.msra.mxu0 %v3773_v15  ;;  %v3825_v15 = vld [vmem:[#allocation5 + $0x530] sm:$0xff]  }
  0x94   :  { %3427 = vmatpush3.bf16.msra.mxu1 %v3774_v16  ;;  %3406 = vmatprep.subr.bf16.mxu0 %v3775_v17  ;;  %v3826_v16 = vld [vmem:[#allocation5 + $0x5b0] sm:$0xff]   ;;  %v3827_v17 = vld [vmem:[#allocation5 + $0x568] sm:$0xff]  }
  0x95   :  { %3428 = vmatprep.subr.bf16.mxu1 %v3776_v18  ;;  %v3828_v18 = vld [vmem:[#allocation5 + $0x5e8] sm:$0xff]  }
  0x97   :  { %3407 = vmatpush3.bf16.msra.mxu0 %v3777_v19  ;;  %v3829_v19 = vld [vmem:[#allocation5 + $0x528] sm:$0xff]  }
  0x98   :  { %3429 = vmatpush3.bf16.msra.mxu1 %v3778_v20  ;;  %3408 = vmatprep.subr.bf16.mxu0 %v3779_v21  ;;  %v3830_v20 = vld [vmem:[#allocation5 + $0x5a8] sm:$0xff]   ;;  %v3831_v21 = vld [vmem:[#allocation5 + $0x560] sm:$0xff]  }
  0x99   :  { %3430 = vmatprep.subr.bf16.mxu1 %v3780_v22  ;;  %v3832_v22 = vld [vmem:[#allocation5 + $0x5e0] sm:$0xff]  }
  0x9b   :  { %3409 = vmatpush3.bf16.msra.mxu0 %v3781_v23  ;;  %v3833_v23 = vld [vmem:[#allocation5 + $0x520] sm:$0xff]  }
  0x9c   :  { %3431 = vmatpush3.bf16.msra.mxu1 %v3782_v24  ;;  %3438 = vmatprep.subr.bf16.mxu0 %v3785_v29  ;;  %v3834_v24 = vld [vmem:[#allocation5 + $0x5a0] sm:$0xff]   ;;  %v3839_v29 = vld [vmem:[#allocation5 + $0x550] sm:$0xff]  }
  0x9d   :  { %3460 = vmatprep.subr.bf16.mxu1 %v3786_v32  ;;  %v3842_v32 = vld [vmem:[#allocation5 + $0x590] sm:$0xff]  }
  0x9e   :  { %2479 = vmatmul.mubr.bf16.vlgmr.msra.gmra.mxu0 %v131_v30  ;;  %v3840_v30 = vld [vmem:[#allocation5 + $0x5d0] sm:$0xff]  }
  0x9f   :  { %2519 = vmatmul.mubr.bf16.vlgmr.msra.gmra.mxu1 %v133_v31  ;;  %3439 = vmatpush3.bf16.msra.mxu0 %v3787_v35  ;;  %v3841_v31 = vld [vmem:[#allocation5 + $0x510] sm:$0xff]   ;;  %v3845_v35 = vld [vmem:[#allocation5 + $0x508] sm:$0xff]  }
  0xa0   :  { %3461 = vmatpush3.bf16.msra.mxu1 %v3788_v36  ;;  %3440 = vmatprep.subr.bf16.mxu0 %v3789_v37  ;;  %v3846_v36 = vld [vmem:[#allocation5 + $0x588] sm:$0xff]   ;;  %v3847_v37 = vld [vmem:[#allocation5 + $0x540] sm:$0xff]  }
  0xa1   :  { %3462 = vmatprep.subr.bf16.mxu1 %v3790_v38  ;;  %2558 = vmatprep.mubr.bf16.mxu0 %v136_v7  ;;  %v3848_v38 = vld [vmem:[#allocation5 + $0x5c0] sm:$0xff]   ;;  %v3875_v7 = vld [vmem:[#allocation5 + $0x610] sm:$0xff]  }
  0xa2   :  { %2598 = vmatprep.mubr.bf16.mxu1 %v138_v10  ;;  %v3878_v10 = vld [vmem:[#allocation5 + $0x6c8] sm:$0xff]  }
  0xa3   :  { %3441 = vmatpush3.bf16.msra.mxu0 %v3791_v39  ;;  %v3849_v39 = vld [vmem:[#allocation5 + $0x500] sm:$0xff]  }
  0xa4   :  { %3463 = vmatpush3.bf16.msra.mxu1 %v3792_v40  ;;  %3442 = vmatprep.subr.bf16.mxu0 %v3793_v41  ;;  %v3850_v40 = vld [vmem:[#allocation5 + $0x580] sm:$0xff]   ;;  %v65_v41 = vld [vmem:[#allocation3 + $0x50] sm:$0xff] }
  0xa5   :  { %3464 = vmatprep.subr.bf16.mxu1 %v3794_v42  ;;  %v66_v42 = vld [vmem:[#allocation3 + $0x58] sm:$0xff] }
  0xa7   :  { %3443 = vmatpush3.bf16.msra.mxu0 %v3795_v43  ;;  %v97_v43 = vcombine.high %v65_v41, %v65_v41 }
  0xa8   :  { %3465 = vmatpush3.bf16.msra.mxu1 %v3796_v44  ;;  %3444 = vmatprep.subr.bf16.mxu0 %v3797_v45  ;;  %v98_v44 = vcombine.high %v66_v42, %v66_v42  ;;  %v3853_v45 = vld [vmem:[#allocation5 + $0x678] sm:$0xff]  }
  0xa9   :  { %3466 = vmatprep.subr.bf16.mxu1 %v3798_v46  ;;  %v139_v46 = vpack.c.bf16 %v65_v41, %v65_v41  ;;  %v3893_v41 = vld [vmem:[#allocation5 + $0x730] sm:$0xff]  }
  0xab   :  { %3445 = vmatpush3.bf16.msra.mxu0 %v3799_v47  ;;  %v141_v47 = vpack.c.bf16 %v66_v42, %v66_v42  ;;  %v3894_v42 = vld [vmem:[#allocation5 + $0x7b0] sm:$0xff]  }
  0xac   :  { %3467 = vmatpush3.bf16.msra.mxu1 %v3800_v48  ;;  %3446 = vmatprep.subr.bf16.mxu0 %v3801_v49  ;;  %v3854_v48 = vld [vmem:[#allocation5 + $0x6f8] sm:$0xff]   ;;  %v140_v49 = vpack.c.bf16 %v97_v43, %v97_v43 }
  0xad   :  { %3468 = vmatprep.subr.bf16.mxu1 %v3802_v50  ;;  %v142_v50 = vpack.c.bf16 %v98_v44, %v98_v44 }
  0xaf   :  { %3447 = vmatpush3.bf16.msra.mxu0 %v3803_v51  ;;  %v3855_v51 = vld [vmem:[#allocation5 + $0x638] sm:$0xff]  }
  0xb0   :  { %3469 = vmatpush3.bf16.msra.mxu1 %v3804_v52  ;;  %3448 = vmatprep.subr.bf16.mxu0 %v3805_v53  ;;  %v3856_v52 = vld [vmem:[#allocation5 + $0x6b8] sm:$0xff]   ;;  %v3857_v53 = vld [vmem:[#allocation5 + $0x670] sm:$0xff]  }
  0xb1   :  { %3470 = vmatprep.subr.bf16.mxu1 %v3806_v54  ;;  %v3858_v54 = vld [vmem:[#allocation5 + $0x6f0] sm:$0xff]  }
  0xb3   :  { %3449 = vmatpush3.bf16.msra.mxu0 %v3807_v55  ;;  %v3859_v55 = vld [vmem:[#allocation5 + $0x630] sm:$0xff]  }
  0xb4   :  { %3471 = vmatpush3.bf16.msra.mxu1 %v3808_v56  ;;  %3450 = vmatprep.subr.bf16.mxu0 %v3809_v57  ;;  %v3860_v56 = vld [vmem:[#allocation5 + $0x6b0] sm:$0xff]   ;;  %v3861_v57 = vld [vmem:[#allocation5 + $0x668] sm:$0xff]  }
  0xb5   :  { %3472 = vmatprep.subr.bf16.mxu1 %v3810_v58  ;;  %v3862_v58 = vld [vmem:[#allocation5 + $0x6e8] sm:$0xff]  }
  0xb7   :  { %3451 = vmatpush3.bf16.msra.mxu0 %v3811_v59  ;;  %v3863_v59 = vld [vmem:[#allocation5 + $0x628] sm:$0xff]  }
  0xb8   :  { %3473 = vmatpush3.bf16.msra.mxu1 %v3812_v60  ;;  %3452 = vmatprep.subr.bf16.mxu0 %v3813_v61  ;;  %v3864_v60 = vld [vmem:[#allocation5 + $0x6a8] sm:$0xff]   ;;  %v3865_v61 = vld [vmem:[#allocation5 + $0x660] sm:$0xff]  }
  0xb9   :  { %3474 = vmatprep.subr.bf16.mxu1 %v3814_v62  ;;  %v3866_v62 = vld [vmem:[#allocation5 + $0x6e0] sm:$0xff]  }
  0xbb   :  { %3453 = vmatpush3.bf16.msra.mxu0 %v3815_v63  ;;  %v3867_v63 = vld [vmem:[#allocation5 + $0x620] sm:$0xff]  }
  0xbc   :  { %3475 = vmatpush3.bf16.msra.mxu1 %v3816_v0  ;;  %3482 = vmatprep.subr.bf16.mxu0 %v3819_v6  ;;  %v3868_v0 = vld [vmem:[#allocation5 + $0x6a0] sm:$0xff]   ;;  %v3874_v6 = vld [vmem:[#allocation5 + $0x6d0] sm:$0xff]  }
  0xbd   :  { %3504 = vmatprep.subr.bf16.mxu1 %v3820_v9  ;;  %v3877_v9 = vld [vmem:[#allocation5 + $0x648] sm:$0xff]  }
  0xbe   :  { %2559 = vmatmul.mubr.bf16.vlgmr.msra.gmra.mxu0 %v135_v4  ;;  %v3872_v4 = vld [vmem:[#allocation5 + $0x698] sm:$0xff]  }
  0xbf   :  { %2599 = vmatmul.mubr.bf16.vlgmr.msra.gmra.mxu1 %v137_v8  ;;  %3483 = vmatpush3.bf16.msra.mxu0 %v3821_v11  ;;  %v3876_v8 = vld [vmem:[#allocation5 + $0x690] sm:$0xff]   ;;  %v3879_v11 = vld [vmem:[#allocation5 + $0x608] sm:$0xff]  }
  0xc0   :  { %3505 = vmatpush3.bf16.msra.mxu1 %v3822_v12  ;;  %3484 = vmatprep.subr.bf16.mxu0 %v3823_v13  ;;  %v3880_v12 = vld [vmem:[#allocation5 + $0x688] sm:$0xff]   ;;  %v3881_v13 = vld [vmem:[#allocation5 + $0x640] sm:$0xff]  }
  0xc1   :  { %3506 = vmatprep.subr.bf16.mxu1 %v3824_v14  ;;  %2638 = vmatprep.mubr.bf16.mxu0 %v140_v49  ;;  %v3882_v14 = vld [vmem:[#allocation5 + $0x6c0] sm:$0xff]   ;;  %v3898_v49 = vld [vmem:[#allocation5 + $0x7a8] sm:$0xff]  }
  0xc2   :  { %2678 = vmatprep.mubr.bf16.mxu1 %v142_v50  ;;  %v3899_v50 = vld [vmem:[#allocation5 + $0x760] sm:$0xff]  }
  0xc3   :  { %3485 = vmatpush3.bf16.msra.mxu0 %v3825_v15  ;;  %v3883_v15 = vld [vmem:[#allocation5 + $0x600] sm:$0xff]  }
  0xc4   :  { %3507 = vmatpush3.bf16.msra.mxu1 %v3826_v16  ;;  %3486 = vmatprep.subr.bf16.mxu0 %v3827_v17  ;;  %v3884_v16 = vld [vmem:[#allocation5 + $0x680] sm:$0xff]  }
  0xc5   :  { %3508 = vmatprep.subr.bf16.mxu1 %v3828_v18  ;;  %v67_v17 = vld [vmem:[#allocation3 + $0x60] sm:$0xff]  ;;  %v68_v18 = vld [vmem:[#allocation3 + $0x68] sm:$0xff] }
  0xc7   :  { %3487 = vmatpush3.bf16.msra.mxu0 %v3829_v19  ;;  %v99_v19 = vcombine.high %v67_v17, %v67_v17 }
  0xc8   :  { %3509 = vmatpush3.bf16.msra.mxu1 %v3830_v20  ;;  %3488 = vmatprep.subr.bf16.mxu0 %v3831_v21  ;;  %v100_v20 = vcombine.high %v68_v18, %v68_v18  ;;  %v3887_v21 = vld [vmem:[#allocation5 + $0x778] sm:$0xff]  }
  0xc9   :  { %3510 = vmatprep.subr.bf16.mxu1 %v3832_v22  ;;  %v143_v22 = vpack.c.bf16 %v67_v17, %v67_v17 }
  0xcb   :  { %3489 = vmatpush3.bf16.msra.mxu0 %v3833_v23  ;;  %v145_v23 = vpack.c.bf16 %v68_v18, %v68_v18 }
  0xcc   :  { %3511 = vmatpush3.bf16.msra.mxu1 %v3834_v24  ;;  %3490 = vmatprep.subr.bf16.mxu0 %v3835_v25 }
  0xcd   :  { %3512 = vmatprep.subr.bf16.mxu1 %v3836_v26  ;;  %v3888_v26 = vld [vmem:[#allocation5 + $0x7f8] sm:$0xff]  }
  0xcf   :  { %3491 = vmatpush3.bf16.msra.mxu0 %v3837_v27  ;;  %v144_v27 = vpack.c.bf16 %v99_v19, %v99_v19 }
  0xd0   :  { %3513 = vmatpush3.bf16.msra.mxu1 %v3838_v28  ;;  %3492 = vmatprep.subr.bf16.mxu0 %v3839_v29  ;;  %v146_v28 = vpack.c.bf16 %v100_v20, %v100_v20  ;;  %v3889_v29 = vld [vmem:[#allocation5 + $0x738] sm:$0xff]  }
  0xd1   :  { %3514 = vmatprep.subr.bf16.mxu1 %v3840_v30  ;;  %v3890_v30 = vld [vmem:[#allocation5 + $0x7b8] sm:$0xff]  }
  0xd3   :  { %3493 = vmatpush3.bf16.msra.mxu0 %v3841_v31  ;;  %v2994_v31 = vld [vmem:[%s4073_s2] ss:$0 sm:$0xff] }
  0xd4   :  { %3515 = vmatpush3.bf16.msra.mxu1 %v3842_v32  ;;  %3494 = vmatprep.subr.bf16.mxu0 %v3843_v33 }
  0xd5   :  { %3516 = vmatprep.subr.bf16.mxu1 %v3844_v34 }
  0xd7   :  { %3495 = vmatpush3.bf16.msra.mxu0 %v3845_v35 }
  0xd8   :  { %3517 = vmatpush3.bf16.msra.mxu1 %v3846_v36  ;;  %3496 = vmatprep.subr.bf16.mxu0 %v3847_v37  ;;  %v3891_v36 = vld [vmem:[#allocation5 + $0x770] sm:$0xff]  }
  0xd9   :  { %3518 = vmatprep.subr.bf16.mxu1 %v3848_v38 }
  0xdb   :  { %3497 = vmatpush3.bf16.msra.mxu0 %v3849_v39  ;;  %v3892_v39 = vld [vmem:[#allocation5 + $0x7f0] sm:$0xff]  }
  0xdc   :  { %3519 = vmatpush3.bf16.msra.mxu1 %v3850_v40  ;;  %3526 = vmatprep.subr.bf16.mxu0 %v3853_v45 }
  0xdd   :  { %3548 = vmatprep.subr.bf16.mxu1 %v3854_v48  ;;  %v3897_v48 = vld [vmem:[#allocation5 + $0x728] sm:$0xff]  }
  0xde   :  { %2639 = vmatmul.mubr.bf16.vlgmr.msra.gmra.mxu0 %v139_v46  ;;  %v3895_v46 = vld [vmem:[#allocation5 + $0x768] sm:$0xff]  }
  0xdf   :  { %2679 = vmatmul.mubr.bf16.vlgmr.msra.gmra.mxu1 %v141_v47  ;;  %3527 = vmatpush3.bf16.msra.mxu0 %v3855_v51  ;;  %v3896_v47 = vld [vmem:[#allocation5 + $0x7e8] sm:$0xff]   ;;  %v3900_v51 = vld [vmem:[#allocation5 + $0x7e0] sm:$0xff]  }
  0xe0   :  { %3549 = vmatpush3.bf16.msra.mxu1 %v3856_v52  ;;  %3528 = vmatprep.subr.bf16.mxu0 %v3857_v53  ;;  %v3901_v52 = vld [vmem:[#allocation5 + $0x720] sm:$0xff]  }
  0xe1   :  { %3550 = vmatprep.subr.bf16.mxu1 %v3858_v54  ;;  %2718 = vmatprep.mubr.bf16.mxu0 %v144_v27  ;;  %v3902_v53 = vld [vmem:[#allocation5 + $0x7a0] sm:$0xff]   ;;  %v3903_v54 = vld [vmem:[#allocation5 + $0x758] sm:$0xff]  }
  0xe2   :  { %2758 = vmatprep.mubr.bf16.mxu1 %v146_v28 }
  0xe3   :  { %3529 = vmatpush3.bf16.msra.mxu0 %v3859_v55  ;;  %v3904_v55 = vld [vmem:[#allocation5 + $0x7d8] sm:$0xff]  }
  0xe4   :  { %3551 = vmatpush3.bf16.msra.mxu1 %v3860_v56  ;;  %3530 = vmatprep.subr.bf16.mxu0 %v3861_v57  ;;  %v3905_v56 = vld [vmem:[#allocation5 + $0x718] sm:$0xff]  }
  0xe5   :  { %3552 = vmatprep.subr.bf16.mxu1 %v3862_v58  ;;  %v3906_v57 = vld [vmem:[#allocation5 + $0x798] sm:$0xff]   ;;  %v3907_v58 = vld [vmem:[#allocation5 + $0x750] sm:$0xff]  }
  0xe7   :  { %3531 = vmatpush3.bf16.msra.mxu0 %v3863_v59  ;;  %v3908_v59 = vld [vmem:[#allocation5 + $0x7d0] sm:$0xff]  }
  0xe8   :  { %3553 = vmatpush3.bf16.msra.mxu1 %v3864_v60  ;;  %3532 = vmatprep.subr.bf16.mxu0 %v3865_v61  ;;  %v3909_v60 = vld [vmem:[#allocation5 + $0x710] sm:$0xff]  }
  0xe9   :  { %3554 = vmatprep.subr.bf16.mxu1 %v3866_v62  ;;  %v3910_v61 = vld [vmem:[#allocation5 + $0x790] sm:$0xff]   ;;  %v3911_v62 = vld [vmem:[#allocation5 + $0x748] sm:$0xff]  }
  0xeb   :  { %3533 = vmatpush3.bf16.msra.mxu0 %v3867_v63  ;;  %v3912_v63 = vld [vmem:[#allocation5 + $0x7c8] sm:$0xff]  }
  0xec   :  { %3555 = vmatpush3.bf16.msra.mxu1 %v3868_v0  ;;  %3534 = vmatprep.subr.bf16.mxu0 %v3869_v1  ;;  %v3913_v0 = vld [vmem:[#allocation5 + $0x708] sm:$0xff]  }
  0xed   :  { %3556 = vmatprep.subr.bf16.mxu1 %v3870_v2  ;;  %v3914_v1 = vld [vmem:[#allocation5 + $0x788] sm:$0xff]   ;;  %v3915_v2 = vld [vmem:[#allocation5 + $0x740] sm:$0xff]  }
  0xef   :  { %3535 = vmatpush3.bf16.msra.mxu0 %v3871_v3  ;;  %v3916_v3 = vld [vmem:[#allocation5 + $0x7c0] sm:$0xff]  }
  0xf0   :  { %3557 = vmatpush3.bf16.msra.mxu1 %v3872_v4  ;;  %3536 = vmatprep.subr.bf16.mxu0 %v3873_v5  ;;  %v3917_v4 = vld [vmem:[#allocation5 + $0x700] sm:$0xff]  }
  0xf1   :  { %3558 = vmatprep.subr.bf16.mxu1 %v3874_v6  ;;  %v3918_v5 = vld [vmem:[#allocation5 + $0x780] sm:$0xff]   ;;  %v69_v6 = vld [vmem:[#allocation3 + $0x70] sm:$0xff] }
  0xf3   :  { %3537 = vmatpush3.bf16.msra.mxu0 %v3875_v7  ;;  %v70_v7 = vld [vmem:[#allocation3 + $0x78] sm:$0xff] }
  0xf4   :  { %3559 = vmatpush3.bf16.msra.mxu1 %v3876_v8  ;;  %3538 = vmatprep.subr.bf16.mxu0 %v3877_v9  ;;  %v101_v8 = vcombine.high %v69_v6, %v69_v6  ;;  %v102_v9 = vcombine.high %v70_v7, %v70_v7 }
  0xf5   :  { %3560 = vmatprep.subr.bf16.mxu1 %v3878_v10 }
  0xf7   :  { %3539 = vmatpush3.bf16.msra.mxu0 %v3879_v11  ;;  %v147_v11 = vpack.c.bf16 %v69_v6, %v69_v6 }
  0xf8   :  { %3561 = vmatpush3.bf16.msra.mxu1 %v3880_v12  ;;  %3540 = vmatprep.subr.bf16.mxu0 %v3881_v13  ;;  %v149_v12 = vpack.c.bf16 %v70_v7, %v70_v7 }
  0xf9   :  { %3562 = vmatprep.subr.bf16.mxu1 %v3882_v14  ;;  %v148_v14 = vpack.c.bf16 %v101_v8, %v101_v8 }
  0xfb   :  { %3541 = vmatpush3.bf16.msra.mxu0 %v3883_v15  ;;  %v150_v15 = vpack.c.bf16 %v102_v9, %v102_v9 }
  0xfc   :  { %3563 = vmatpush3.bf16.msra.mxu1 %v3884_v16  ;;  %3570 = vmatprep.subr.bf16.mxu0 %v3887_v21 }
  0xfd   :  { %3592 = vmatprep.subr.bf16.mxu1 %v3888_v26 }
  0xfe   :  { %v3278_v24 = vpop.f32.mrf.mxu0  ;;  %2719 = vmatmul.mubr.bf16.vlgmr.msra.gmra.mxu0 %v143_v22 }
  0xff   :  { %v3300_v25 = vpop.f32.mrf.mxu1  ;;  %2759 = vmatmul.mubr.bf16.vlgmr.msra.gmra.mxu1 %v145_v23  ;;  %3571 = vmatpush3.bf16.msra.mxu0 %v3889_v29 }
 0x100   :  { %v3279_v32 = vpop.f32.mrf.mxu0  ;;  %3593 = vmatpush3.bf16.msra.mxu1 %v3890_v30  ;;  %3572 = vmatprep.subr.bf16.mxu0 %v3891_v36 }
 0x101   :  { %v3301_v33 = vpop.f32.mrf.mxu1  ;;  %v3280_v34 = vadd.f32 %v3279_v32, %v3278_v24  ;;  %3594 = vmatprep.subr.bf16.mxu1 %v3892_v39  ;;  %2798 = vmatprep.mubr.bf16.mxu0 %v148_v14  ;;  %v3981_v39 = vmov 0.0  }
 0x102   :  { %v3302_v35 = vadd.f32 %v3301_v33, %v3300_v25  ;;  %v3281_v37 = vpop.f32.mrf.mxu0  ;;  %2838 = vmatprep.mubr.bf16.mxu1 %v150_v15 }
 0x103   :  { %v3303_v38 = vpop.f32.mrf.mxu1  ;;  %v2241_v40 = vadd.f32 %v3280_v34, %v2994_v31  ;;  %3573 = vmatpush3.bf16.msra.mxu0 %v3893_v41  ;;  %v3923_v41 = vld [vmem:[%s4074_s3 + $0x28] sm:$0xff]  }
 0x104   :  { %v3282_v43 = vpop.f32.mrf.mxu0  ;;  %3595 = vmatpush3.bf16.msra.mxu1 %v3894_v42  ;;  %3574 = vmatprep.subr.bf16.mxu0 %v3895_v46  ;;  %v3921_v38 = vld [vmem:[%s4074_s3 + $0x38] sm:$0xff]   ;;  %v3924_v42 = vld [vmem:[%s4074_s3 + $0x20] sm:$0xff]  }
 0x105   :  { %v3304_v44 = vpop.f32.mrf.mxu1  ;;  %v4035_v45 = vadd.f32 %v3302_v35, %v2241_v40  ;;  %3596 = vmatprep.subr.bf16.mxu1 %v3896_v47  ;;  %v3922_v40 = vld [vmem:[%s4074_s3 + $0x30] sm:$0xff]   ;;  %v3925_v43 = vld [vmem:[%s4074_s3 + $0x18] sm:$0xff]  }
 0x107   :  { %3575 = vmatpush3.bf16.msra.mxu0 %v3897_v48 }
 0x108   :  { %3597 = vmatpush3.bf16.msra.mxu1 %v3898_v49  ;;  %3576 = vmatprep.subr.bf16.mxu0 %v3899_v50  ;;  %v3926_v50 = vld [vmem:[%s4074_s3 + $0x10] sm:$0xff]  }
 0x109   :  { %3598 = vmatprep.subr.bf16.mxu1 %v3900_v51 }
 0x10b   :  { %3577 = vmatpush3.bf16.msra.mxu0 %v3901_v52 }
 0x10c   :  { %3599 = vmatpush3.bf16.msra.mxu1 %v3902_v53  ;;  %3578 = vmatprep.subr.bf16.mxu0 %v3903_v54 }
 0x10d   :  { %3600 = vmatprep.subr.bf16.mxu1 %v3904_v55 }
 0x10f   :  { %3579 = vmatpush3.bf16.msra.mxu0 %v3905_v56 }
 0x110   :  { %3601 = vmatpush3.bf16.msra.mxu1 %v3906_v57  ;;  %3580 = vmatprep.subr.bf16.mxu0 %v3907_v58  ;;  %v3927_v57 = vld [vmem:[%s4074_s3 + $0x8] sm:$0xff]   ;;  %v3928_v58 = vld [vmem:[%s4074_s3] sm:$0xff]  }
 0x111   :  { %3602 = vmatprep.subr.bf16.mxu1 %v3908_v59 }
 0x113   :  { %3581 = vmatpush3.bf16.msra.mxu0 %v3909_v60 }
 0x114   :  { %3603 = vmatpush3.bf16.msra.mxu1 %v3910_v61  ;;  %3582 = vmatprep.subr.bf16.mxu0 %v3911_v62 }
 0x115   :  { %3604 = vmatprep.subr.bf16.mxu1 %v3912_v63 }
 0x117   :  { %3583 = vmatpush3.bf16.msra.mxu0 %v3913_v0 }
 0x118   :  { %3605 = vmatpush3.bf16.msra.mxu1 %v3914_v1  ;;  %3584 = vmatprep.subr.bf16.mxu0 %v3915_v2 }
 0x119   :  { %3606 = vmatprep.subr.bf16.mxu1 %v3916_v3 }
 0x11b   :  { %3585 = vmatpush3.bf16.msra.mxu0 %v3917_v4 }
 0x11c   :  { %3607 = vmatpush3.bf16.msra.mxu1 %v3918_v5  ;;  %3623 = vmatprep.subr.bf16.mxu0 %v3981_v39 }
 0x11e   :  { %v3322_v10 = vpop.f32.mrf.mxu0  ;;  %2799 = vmatmul.mubr.bf16.vlgmr.msra.gmra.mxu0 %v147_v11 }
 0x11f   :  { %v3344_v13 = vpop.f32.mrf.mxu1  ;;  %2839 = vmatmul.mubr.bf16.vlgmr.msra.gmra.mxu1 %v149_v12  ;;  %3624 = vmatpush3.bf16.msra.mxu0 %v3921_v38 }
 0x120   :  { %v3323_v16 = vpop.f32.mrf.mxu0  ;;  %3625 = vmatprep.subr.bf16.mxu0 %v3981_v39  ;;  %3639 = vmatprep.mubr.msk.bf16.mxu0 %vm3982_vm0, %v3981_v39 }
 0x121   :  { %v3324_v17 = vadd.f32 %v3323_v16, %v3322_v10  ;;  %v3345_v18 = vpop.f32.mrf.mxu1 }
 0x122   :  { %v3346_v19 = vadd.f32 %v3345_v18, %v3344_v13  ;;  %v3325_v20 = vpop.f32.mrf.mxu0 }
 0x123   :  { %v2321_v21 = vadd.f32 %v3324_v17, %v4035_v45  ;;  %v3347_v22 = vpop.f32.mrf.mxu1  ;;  %3626 = vmatpush3.bf16.msra.mxu0 %v3922_v40 }
 0x124   :  { %v3326_v23 = vpop.f32.mrf.mxu0  ;;  %3627 = vmatprep.subr.bf16.mxu0 %v3981_v39 }
 0x125   :  { %v2361_v24 = vadd.f32 %v3346_v19, %v2321_v21  ;;  %v3348_v25 = vpop.f32.mrf.mxu1 }
 0x127   :  { %3628 = vmatpush3.bf16.msra.mxu0 %v3923_v41 }
 0x128   :  { %3629 = vmatprep.subr.bf16.mxu0 %v3981_v39 }
 0x12b   :  { %3630 = vmatpush3.bf16.msra.mxu0 %v3924_v42 }
 0x12c   :  { %3631 = vmatprep.subr.bf16.mxu0 %v3981_v39 }
 0x12f   :  { %3632 = vmatpush3.bf16.msra.mxu0 %v3925_v43 }
 0x130   :  { %3633 = vmatprep.subr.bf16.mxu0 %v3981_v39 }
 0x133   :  { %3634 = vmatpush3.bf16.msra.mxu0 %v3926_v50 }
 0x134   :  { %3635 = vmatprep.subr.bf16.mxu0 %v3981_v39 }
 0x137   :  { %3636 = vmatpush3.bf16.msra.mxu0 %v3927_v57 }
 0x138   :  { %3637 = vmatprep.subr.bf16.mxu0 %v3981_v39 }
 0x13b   :  { %3638 = vmatpush3.bf16.msra.mxu0 %v3928_v58 }
 0x13e   :  { %v3366_v26 = vpop.f32.mrf.mxu0 }
 0x13f   :  { %v3388_v27 = vpop.f32.mrf.mxu1 }
 0x140   :  { %v3367_v28 = vpop.f32.mrf.mxu0 }
 0x141   :  { %v3389_v29 = vpop.f32.mrf.mxu1  ;;  %v3368_v30 = vadd.f32 %v3367_v28, %v3366_v26 }
 0x142   :  { %v3390_v31 = vadd.f32 %v3389_v29, %v3388_v27  ;;  %v3369_v32 = vpop.f32.mrf.mxu0 }
 0x143   :  { %v3391_v33 = vpop.f32.mrf.mxu1  ;;  %v2401_v34 = vadd.f32 %v3368_v30, %v2361_v24 }
 0x144   :  { %v3370_v35 = vpop.f32.mrf.mxu0 }
 0x145   :  { %v3392_v36 = vpop.f32.mrf.mxu1  ;;  %v2441_v37 = vadd.f32 %v3390_v31, %v2401_v34 }
 0x15e   :  { %v3410_v44 = vpop.f32.mrf.mxu0 }
 0x15f   :  { %v3432_v45 = vpop.f32.mrf.mxu1 }
 0x160   :  { %v3411_v46 = vpop.f32.mrf.mxu0 }
 0x161   :  { %v3433_v47 = vpop.f32.mrf.mxu1  ;;  %v3412_v48 = vadd.f32 %v3411_v46, %v3410_v44 }
 0x162   :  { %v3434_v49 = vadd.f32 %v3433_v47, %v3432_v45  ;;  %v3413_v51 = vpop.f32.mrf.mxu0  ;;  %v3251_v45 = vld [vmem:[%s4075_s4] ss:$0 sm:$0xff] }
 0x163   :  { %v3435_v52 = vpop.f32.mrf.mxu1  ;;  %v2481_v53 = vadd.f32 %v3412_v48, %v2441_v37 }
 0x164   :  { %v3414_v54 = vpop.f32.mrf.mxu0 }
 0x165   :  { %v3436_v55 = vpop.f32.mrf.mxu1  ;;  %v2521_v56 = vadd.f32 %v3434_v49, %v2481_v53  ;;  %v3260_v49 = vld [vmem:[%s4076_s5] ss:$0 sm:$0xff] }
 0x166   :  { %v3261_v55 = vld [vmem:[#allocation2] ss:$0 sm:$0xff] }
 0x17e   :  { %v3454_v59 = vpop.f32.mrf.mxu0 }
 0x17f   :  { %v3476_v60 = vpop.f32.mrf.mxu1 }
 0x180   :  { %v3455_v61 = vpop.f32.mrf.mxu0 }
 0x181   :  { %v3456_v62 = vadd.f32 %v3455_v61, %v3454_v59  ;;  %v3477_v63 = vpop.f32.mrf.mxu1 }
 0x182   :  { %v3478_v0 = vadd.f32 %v3477_v63, %v3476_v60  ;;  %v3457_v1 = vpop.f32.mrf.mxu0 }
 0x183   :  { %v2561_v2 = vadd.f32 %v3456_v62, %v2521_v56  ;;  %v3479_v3 = vpop.f32.mrf.mxu1 }
 0x184   :  { %v3458_v4 = vpop.f32.mrf.mxu0 }
 0x185   :  { %v2601_v5 = vadd.f32 %v3478_v0, %v2561_v2  ;;  %v3480_v6 = vpop.f32.mrf.mxu1 }
 0x19e   :  { %v3498_v7 = vpop.f32.mrf.mxu0 }
 0x19f   :  { %v3520_v8 = vpop.f32.mrf.mxu1 }
 0x1a0   :  { %v3499_v9 = vpop.f32.mrf.mxu0 }
 0x1a1   :  { %v3521_v10 = vpop.f32.mrf.mxu1  ;;  %v3500_v23 = vadd.f32 %v3499_v9, %v3498_v7 }
 0x1a2   :  { %v3501_v11 = vpop.f32.mrf.mxu0  ;;  %v3522_v25 = vadd.f32 %v3521_v10, %v3520_v8 }
 0x1a3   :  { %v3523_v12 = vpop.f32.mrf.mxu1  ;;  %v2641_v24 = vadd.f32 %v3500_v23, %v2601_v5 }
 0x1a4   :  { %v3502_v13 = vpop.f32.mrf.mxu0 }
 0x1a5   :  { %v3524_v14 = vpop.f32.mrf.mxu1  ;;  %v2681_v27 = vadd.f32 %v3522_v25, %v2641_v24 }
 0x1be   :  { %v3542_v15 = vpop.f32.mrf.mxu0 }
 0x1bf   :  { %v3564_v16 = vpop.f32.mrf.mxu1 }
 0x1c0   :  { %v3543_v17 = vpop.f32.mrf.mxu0 }
 0x1c1   :  { %v3565_v18 = vpop.f32.mrf.mxu1  ;;  %v3544_v26 = vadd.f32 %v3543_v17, %v3542_v15 }
 0x1c2   :  { %v3545_v19 = vpop.f32.mrf.mxu0  ;;  %v3566_v29 = vadd.f32 %v3565_v18, %v3564_v16 }
 0x1c3   :  { %v3567_v20 = vpop.f32.mrf.mxu1  ;;  %v2721_v28 = vadd.f32 %v3544_v26, %v2681_v27 }
 0x1c4   :  { %v3546_v21 = vpop.f32.mrf.mxu0 }
 0x1c5   :  { %v3568_v22 = vpop.f32.mrf.mxu1  ;;  %v2761_v34 = vadd.f32 %v3566_v29, %v2721_v28 }
 0x1de   :  { %v3586_v30 = vpop.f32.mrf.mxu0 }
 0x1df   :  { %v3608_v31 = vpop.f32.mrf.mxu1 }
 0x1e0   :  { %v3587_v32 = vpop.f32.mrf.mxu0 }
 0x1e1   :  { %v3609_v33 = vpop.f32.mrf.mxu1  ;;  %v3588_v35 = vadd.f32 %v3587_v32, %v3586_v30 }
 0x1e2   :  { %v3589_v36 = vpop.f32.mrf.mxu0  ;;  %v3610_v39 = vadd.f32 %v3609_v33, %v3608_v31 }
 0x1e3   :  { %v3611_v37 = vpop.f32.mrf.mxu1  ;;  %v2801_v38 = vadd.f32 %v3588_v35, %v2761_v34 }
 0x1e4   :  { %v3590_v40 = vpop.f32.mrf.mxu0 }
 0x1e5   :  { %v3612_v41 = vpop.f32.mrf.mxu1  ;;  %v2841_v42 = vadd.f32 %v3610_v39, %v2801_v38 }
 0x1e7   :  { %v2846_v43 = vmax.f32 %v2841_v42, 0.0 }
 0x1e9   :  { %v2847_v44 = vpack.c.bf16 %v2846_v43, %v2846_v43 }
 0x1eb   :  { %3640 = vmatmul.mubr.bf16.vlgmr.msra.gmra.mxu0 %v2847_v44 }
 0x2ab   :  { %v2953_v46 = vpop.f32.mrf.mxu0 }
 0x2ac   :  { %v2954_v47 = vadd.f32 %v3251_v45, %v2953_v46 }
 0x2ad   :  { %v3641_v48 = vpop.f32.mrf.mxu0 }
 0x2ae   :  { %v2959_v50 = vmax.f32 %v2954_v47, 0.0 }
 0x2af   :  { %v2956_v51 = vpop.f32.mrf.mxu0 }
 0x2b0   :  { %v2967_v52 = vmul.f32 %v3260_v49, %v2959_v50 }
 0x2b1   :  { %v3642_v53 = vpop.f32.mrf.mxu0 }
 0x2b2   :  { %v2969_v54 = vsel %vm2968_vm1, %v2967_v52, 0.0 }
 0x2b3   :  { %2970 = vadd.xlane.f32.xlu0 %v2969_v54 }
 0x33c   :  { %v2971_v56 = vpop.xlane.xlu0 %2970 }
 0x33d   :  { %v2979_v57 = vadd.f32 %v3261_v55, %v2971_v56 }
 0x33f   :  { %v2980_v58 = vsub.f32 0.0, %v2979_v57 }
 0x341   :  { %v2981_v59 = vmul.f32 1.442695, %v2980_v58 }
 0x343   :  { %3929 = vpow2.f32 %v2981_v59 }
 0x350   :  { %v3930_v60 = vpop.eup %3929 }
 0x351   :  { %v2983_v61 = vadd.f32 1.0, %v3930_v60 }
 0x353   :  { %3931 = vrcp.f32 %v2983_v61 }
 0x360   :  { %v3932_v62 = vpop.eup %3931 }
 0x361   :  { %2987 = vst.msk [vmem:[%s4078_s7] sm:$0xf] %vm2986_vm2, %v3932_v62 }
 0x362   :  { %2992 = vsyncpa [#allocation4], 1 }
 0x363   :  { %2993 = vsyncpa [#allocation6], 1 }

</bundles_post_ra>
